<compile_context>
chip_gen: v5e
topology: v5e:2x2
jax: 0.10.0
libtpu: 0.0.40
codegen_flags: <defaults>
</compile_context>

<pallas_src>
import jax
import jax.numpy as jnp
from jax.experimental import pallas as pl
from jax.experimental.pallas import tpu as pltpu


def _round_up(x, m):
    return ((x + m - 1) // m) * m


def _classifier_kernel(x_ref, w_ref, o_ref):
    # x_ref: [TB, K]  bf16 activation tile
    # w_ref: [TN, K]  bf16 weight tile in PyTorch layout (row = class); contracted on dim 1
    # o_ref: [TB, TN] f32 lane-dense output tile (TN multiple of 128)
    logits = jax.lax.dot_general(
        x_ref[...], w_ref[...],
        dimension_numbers=(((1,), (1,)), ((), ())),
        preferred_element_type=jnp.float32,
    )
    # sigmoid(z) = 1 / (1 + exp(-z)): exp and approx-reciprocal both run on the EUP slot,
    # keeping the 4 VALU slots free for the add/store path.
    t = jnp.exp(-logits)
    o_ref[...] = pl.reciprocal(1.0 + t, approx=True)


def classifier_forward(x, w, *, block_b=256, block_n=2048):
    """sigmoid(x @ w.T) with w in PyTorch nn.Linear layout [num_classes, 256].

    x: [B, 256] float
    w: [num_classes, 256] float
    returns: [B, num_classes] float32
    """
    B, K = x.shape
    N, K2 = w.shape
    assert K == K2

    # Batch tile: multiple of 16 (bf16 sublane packing); pad B to a whole number of tiles.
    tb = min(block_b, _round_up(B, 16))
    b_pad = _round_up(B, tb)

    # Class tile: multiple of 128 (lane-dense stores); pad N to a whole number of tiles.
    tn = min(block_n, _round_up(N, 128))
    n_pad = _round_up(N, tn)

    x_p = x if b_pad == B else jnp.pad(x, ((0, b_pad - B), (0, 0)))
    w_p = w if n_pad == N else jnp.pad(w, ((0, n_pad - N), (0, 0)))

    # bf16 inputs halve HBM traffic; the MXU accumulates in f32 (preferred_element_type).
    x_bf = x_p.astype(jnp.bfloat16)
    w_bf = w_p.astype(jnp.bfloat16)

    grid = (b_pad // tb, n_pad // tn)

    out = pl.pallas_call(
        _classifier_kernel,
        out_shape=jax.ShapeDtypeStruct((b_pad, n_pad), jnp.float32),
        grid_spec=pltpu.PrefetchScalarGridSpec(
            num_scalar_prefetch=0,
            grid=grid,
            in_specs=[
                pl.BlockSpec((tb, K), lambda i, j: (i, 0)),
                # Constant over the batch axis -> the W tile stays VMEM-resident across i.
                pl.BlockSpec((tn, K), lambda i, j: (j, 0)),
            ],
            out_specs=pl.BlockSpec((tb, tn), lambda i, j: (i, j)),
        ),
        compiler_params=pltpu.CompilerParams(
            # K is kept whole, so both grid axes are independent -> shardable across
            # TensorCores on megacore parts (v7x).
            dimension_semantics=("parallel", "parallel"),
            # Safe on all generations; tiles here are well under this budget (v7x: 64 MiB phys).
            vmem_limit_bytes=32 * 1024 * 1024,
        ),
        cost_estimate=pl.CostEstimate(
            flops=2 * b_pad * K * n_pad,
            bytes_accessed=2 * b_pad * K + 2 * n_pad * K + 4 * b_pad * n_pad,
            transcendentals=b_pad * n_pad,
        ),
    )(x_bf, w_bf)

    # Padded (zero-weight) classes produce sigmoid(0) = 0.5 -> must be sliced off.
    return out[:B, :N]


if __name__ == "__main__":
    num_classes = 10
    B, K = 8, 256

    key = jax.random.PRNGKey(0)
    kx, kw = jax.random.split(key)

    x = jax.random.normal(kx, (B, K), dtype=jnp.float32)
    # Deterministic weight init mimicking nn.Linear default: U[-1/sqrt(K), 1/sqrt(K)]
    bound = 1.0 / (K ** 0.5)
    w = jax.random.uniform(kw, (num_classes, K), dtype=jnp.float32,
                           minval=-bound, maxval=bound)

    out = classifier_forward(x, w)
    out = jax.block_until_ready(out)

    # Reference in plain f32 JAX; kernel uses bf16 inputs + EUP approx reciprocal,
    # so compare at a bf16-appropriate tolerance.
    ref = jax.nn.sigmoid(x @ w.T)
    assert out.shape == (B, num_classes)
    assert jnp.allclose(out, ref, atol=3e-2, rtol=0.0), float(jnp.max(jnp.abs(out - ref)))

    print("KERNEL_OK")
</pallas_src>

<mosaic_0001>
module attributes {stable_mosaic.version = 11 : i64} {
  func.func @_classifier_kernel(%arg0: i32, %arg1: i32, %arg2: memref<16x256xbf16, #tpu.memory_space<vmem>>, %arg3: memref<128x256xbf16, #tpu.memory_space<vmem>>, %arg4: memref<16x128xf32, #tpu.memory_space<vmem>>) attributes {dimension_semantics = [#tpu.dimension_semantics<parallel>, #tpu.dimension_semantics<parallel>], iteration_bounds = array<i64: 1, 1>, scalar_prefetch = 0 : i64, scratch_operands = 0 : i64, tpu.core_type = #tpu.core_type<tc>, window_params = [{transform_indices = @transform_0, window_bounds = array<i64: 16, 256>}, {transform_indices = @transform_1, window_bounds = array<i64: 128, 256>}, {transform_indices = @transform_2, window_bounds = array<i64: 16, 128>}]} {
    %c0 = arith.constant 0 : index
    %c0_0 = arith.constant 0 : index
    %0 = vector.load %arg2[%c0, %c0_0] : memref<16x256xbf16, #tpu.memory_space<vmem>>, vector<16x256xbf16>
    %c0_1 = arith.constant 0 : index
    %c0_2 = arith.constant 0 : index
    %1 = vector.load %arg3[%c0_1, %c0_2] : memref<128x256xbf16, #tpu.memory_space<vmem>>, vector<128x256xbf16>
    %cst = arith.constant dense<0.000000e+00> : vector<16x128xf32>
    %2 = tpu.matmul %0, %1, %cst {dimension_numbers = #tpu.dot_dimension_numbers<[1], [1], [0], [0], [0, 0, 1, 0], [], []>} : vector<16x256xbf16>, vector<128x256xbf16>, vector<16x128xf32> -> vector<16x128xf32>
    %cst_3 = arith.constant 0.000000e+00 : f32
    %3 = vector.broadcast %cst_3 : f32 to vector<16x128xf32>
    %4 = arith.subf %3, %2 : vector<16x128xf32>
    %5 = math.exp %4 : vector<16x128xf32>
    %cst_4 = arith.constant 1.000000e+00 : f32
    %6 = vector.broadcast %cst_4 : f32 to vector<16x128xf32>
    %7 = arith.addf %6, %5 : vector<16x128xf32>
    %8 = tpu.reciprocal %7 {approx = true} : vector<16x128xf32> -> vector<16x128xf32>
    %c0_5 = arith.constant 0 : index
    %c0_6 = arith.constant 0 : index
    %9 = vector.load %arg4[%c0_5, %c0_6] : memref<16x128xf32, #tpu.memory_space<vmem>>, vector<16x128xf32>
    tpu.vector_store %arg4[%c0_5, %c0_6], %8 {strides = array<i32>} : memref<16x128xf32, #tpu.memory_space<vmem>>, vector<16x128xf32>,
    return
  }
  func.func @transform_0(%arg0: i32, %arg1: i32) -> (i32, i32) {
    %c0_i32 = arith.constant 0 : i32
    %c0_i32_0 = arith.constant 0 : i32
    return %arg0, %c0_i32 : i32, i32
  }
  func.func @transform_1(%arg0: i32, %arg1: i32) -> (i32, i32) {
    %c0_i32 = arith.constant 0 : i32
    %c0_i32_0 = arith.constant 0 : i32
    return %arg1, %c0_i32 : i32, i32
  }
  func.func @transform_2(%arg0: i32, %arg1: i32) -> (i32, i32) {
    %c0_i32 = arith.constant 0 : i32
    return %arg0, %arg1 : i32, i32
  }
}

</mosaic_0001>

<bundles_post_ra>
// kernel: tpu_custom_call.1
= control target key start
LH: loop header
LB: loop body
LE: loop exit
PB: predicated region body
PF: predicated region fallthrough
CT: control target
= control target key end

     0   :  { %7 = vsyncpa [#allocation3], 0  ;;  %s431_s0 = inlined_call_operand.hbm [shape: bf16[16,256], index: 0, kind: input, shape index: {}]   ;;  %s432_s1 = inlined_call_operand.hbm [shape: bf16[128,256], index: 1, kind: input, shape index: {}]   ;;  %s433_s2 = inlined_call_operand.hbm [shape: f32[16,128], index: 2, kind: output, shape index: {}]  }
   0x1   :  { %8 = vsyncpa [#allocation6], 0 }
   0x2   :  { %9 = vsyncpa [#allocation4], 0  ;;  %s14_s11 = sshll.u32 %s431_s0, 4  ;;  %s393_s12 = smov [#allocation2]   ;;  %s15_s11 = int_to_ptr.hbm [resolvable:$true] %s14_s11 }
   0x3   :  { %s16_s13 = sshll.u32 %s393_s12, 4  ;;  %s27_s16 = sshll.u32 %s432_s1, 4  ;;  %s17_s13 = int_to_ptr.vmem [resolvable:$true] %s16_s13  ;;  %s28_s16 = int_to_ptr.hbm [resolvable:$true] %s27_s16 }
   0x4   :  { %s394_s17 = smov 128   ;;  %s395_s18 = smov 8  }
   0x5   :  { %22 = dma.hbm_to_vmem [thread:$0]  %s15_s11, 256, %s17_s13, [#allocation3], %s394_s17, %s394_s17, %s395_s18  }
   0x6   :  { %s396_s19 = smov [#allocation5]  }
   0x7   :  { %s29_s20 = sshll.u32 %s396_s19, 4  ;;  %s30_s20 = int_to_ptr.vmem [resolvable:$true] %s29_s20 }
   0x8   :  { %35 = dma.hbm_to_vmem [thread:$0]  %s28_s16, 2048, %s30_s20, [#allocation6], %s394_s17, %s394_s17, %s395_s18  }
   0x9   :  { %387 = dma.done.wait [#allocation3], 256  }
   0xa   :  { %388 = vsyncadd [#allocation3], 4294967040 }
   0xb   :  { %389 = dma.done.wait [#allocation6], 2048  }
   0xc   :  { %390 = vsyncadd [#allocation6], 4294965248  ;;  %v278_v0 = vld [vmem:[#allocation5 + $0x70] sm:$0xf]  ;;  %v301_v1 = vld [vmem:[#allocation5 + $0x74] sm:$0xf0] }
   0xd   :  { %v300_v2 = vld [vmem:[#allocation5 + $0x74] sm:$0xf]  ;;  %v279_v3 = vor.u32 %v301_v1, %v278_v0  ;;  %v280_v4 = vld [vmem:[#allocation5 + $0x78] sm:$0xf0]  ;;  %v270_v6 = vld [vmem:[#allocation5 + $0x60] sm:$0xf] }
   0xe   :  { %v283_v5 = vor.u32 %v300_v2, %v280_v4  ;;  %v299_v7 = vld [vmem:[#allocation5 + $0x64] sm:$0xf0]  ;;  %v298_v8 = vld [vmem:[#allocation5 + $0x64] sm:$0xf]  ;;  %v272_v9 = vld [vmem:[#allocation5 + $0x68] sm:$0xf0] }
   0xf   :  { %152 = vmatpush.bf16.xpose.msra.mxu0 %v279_v3  ;;  %v271_v10 = vor.u32 %v299_v7, %v270_v6  ;;  %v275_v11 = vor.u32 %v298_v8, %v272_v9  ;;  %v262_v12 = vld [vmem:[#allocation5 + $0x50] sm:$0xf]  ;;  %v297_v13 = vld [vmem:[#allocation5 + $0x54] sm:$0xf0]  ;;  %v296_v14 = vld [vmem:[#allocation5 + $0x54] sm:$0xf] }
  0x10   :  { %166 = vmatpush.bf16.xpose.msra.mxu1 %v283_v5  ;;  %v264_v15 = vld [vmem:[#allocation5 + $0x58] sm:$0xf0]  ;;  %v263_v16 = vor.u32 %v297_v13, %v262_v12  ;;  %v254_v18 = vld [vmem:[#allocation5 + $0x40] sm:$0xf]  ;;  %v295_v19 = vld [vmem:[#allocation5 + $0x44] sm:$0xf0] }
  0x11   :  { %v267_v17 = vor.u32 %v296_v14, %v264_v15  ;;  %v294_v20 = vld [vmem:[#allocation5 + $0x44] sm:$0xf]  ;;  %v256_v21 = vld [vmem:[#allocation5 + $0x48] sm:$0xf0]  ;;  %v255_v22 = vor.u32 %v295_v19, %v254_v18  ;;  %v246_v24 = vld [vmem:[#allocation5 + $0x30] sm:$0xf] }
  0x12   :  { %v259_v23 = vor.u32 %v294_v20, %v256_v21  ;;  %v293_v25 = vld [vmem:[#allocation5 + $0x34] sm:$0xf0]  ;;  %v292_v26 = vld [vmem:[#allocation5 + $0x34] sm:$0xf]  ;;  %v248_v27 = vld [vmem:[#allocation5 + $0x38] sm:$0xf0] }
  0x13   :  { %v247_v28 = vor.u32 %v293_v25, %v246_v24  ;;  %v251_v29 = vor.u32 %v292_v26, %v248_v27  ;;  %v238_v30 = vld [vmem:[#allocation5 + $0x20] sm:$0xf]  ;;  %v291_v31 = vld [vmem:[#allocation5 + $0x24] sm:$0xf0]  ;;  %v290_v32 = vld [vmem:[#allocation5 + $0x24] sm:$0xf] }
  0x14   :  { %v240_v33 = vld [vmem:[#allocation5 + $0x28] sm:$0xf0]  ;;  %v239_v34 = vor.u32 %v291_v31, %v238_v30  ;;  %v230_v36 = vld [vmem:[#allocation5 + $0x10] sm:$0xf]  ;;  %v289_v37 = vld [vmem:[#allocation5 + $0x14] sm:$0xf0] }
  0x15   :  { %v243_v35 = vor.u32 %v290_v32, %v240_v33  ;;  %v288_v38 = vld [vmem:[#allocation5 + $0x14] sm:$0xf]  ;;  %v232_v39 = vld [vmem:[#allocation5 + $0x18] sm:$0xf0]  ;;  %v231_v40 = vor.u32 %v289_v37, %v230_v36  ;;  %v222_v42 = vld [vmem:[#allocation5] sm:$0xf] }
  0x16   :  { %v235_v41 = vor.u32 %v288_v38, %v232_v39  ;;  %v287_v43 = vld [vmem:[#allocation5 + $0x4] sm:$0xf0]  ;;  %v286_v44 = vld [vmem:[#allocation5 + $0x4] sm:$0xf]  ;;  %v224_v45 = vld [vmem:[#allocation5 + $0x8] sm:$0xf0] }
  0x17   :  { %153 = vmatpush.bf16.xpose.msra.mxu0 %v271_v10  ;;  %v223_v46 = vor.u32 %v287_v43, %v222_v42  ;;  %v227_v47 = vor.u32 %v286_v44, %v224_v45  ;;  %v214_v48 = vld [vmem:[#allocation2] sm:$0xf]  ;;  %v285_v49 = vld [vmem:[#allocation2 + $0x4] sm:$0xf0]  ;;  %v284_v50 = vld [vmem:[#allocation2 + $0x4] sm:$0xf] }
  0x18   :  { %167 = vmatpush.bf16.xpose.msra.mxu1 %v275_v11  ;;  %v216_v51 = vld [vmem:[#allocation2 + $0x8] sm:$0xf0]  ;;  %v215_v52 = vor.u32 %v285_v49, %v214_v48  ;;  %s397_s0 = smov [#allocation7]   ;;  %s198_s23 = sshll.u32 %s433_s2, 4  ;;  %s199_s23 = int_to_ptr.hbm [resolvable:$true] %s198_s23 }
  0x19   :  { %v219_v53 = vor.u32 %v284_v50, %v216_v51  ;;  %s196_s1 = sshll.u32 %s397_s0, 4  ;;  %s197_s1 = int_to_ptr.vmem [resolvable:$true] %s196_s1 }
  0x1f   :  { %154 = vmatpush.bf16.xpose.msra.mxu0 %v263_v16 }
  0x20   :  { %168 = vmatpush.bf16.xpose.msra.mxu1 %v267_v17 }
  0x27   :  { %155 = vmatpush.bf16.xpose.msra.mxu0 %v255_v22 }
  0x28   :  { %169 = vmatpush.bf16.xpose.msra.mxu1 %v259_v23 }
  0x2f   :  { %156 = vmatpush.bf16.xpose.msra.mxu0 %v247_v28 }
  0x30   :  { %170 = vmatpush.bf16.xpose.msra.mxu1 %v251_v29 }
  0x37   :  { %157 = vmatpush.bf16.xpose.msra.mxu0 %v239_v34 }
  0x38   :  { %171 = vmatpush.bf16.xpose.msra.mxu1 %v243_v35 }
  0x3f   :  { %158 = vmatpush.bf16.xpose.msra.mxu0 %v231_v40 }
  0x40   :  { %172 = vmatpush.bf16.xpose.msra.mxu1 %v235_v41 }
  0x47   :  { %159 = vmatpush.bf16.xpose.msra.mxu0 %v223_v46 }
  0x48   :  { %173 = vmatpush.bf16.xpose.msra.mxu1 %v227_v47 }
  0x4e   :  { %160 = vmatmul.bf16.vlgmr.msra.gmra.mxu0 %v215_v52 }
  0x4f   :  { %174 = vmatmul.bf16.vlgmr.msra.gmra.mxu1 %v219_v53 }
  0xcb   :  { %v161_v54 = vpop.f32.mrf.mxu0 }
  0xcc   :  { %v175_v55 = vpop.f32.mrf.mxu1 }
  0xcd   :  { %v176_v56 = vadd.f32 %v175_v55, %v161_v54 }
  0xcf   :  { %v180_v57 = vsub.f32 0.0, %v176_v56 }
  0xd1   :  { %v182_v58 = vmul.f32 1.442695, %v180_v57 }
  0xd3   :  { %307 = vpow2.f32 %v182_v58  ;;  %v163_v59 = vpop.f32.mrf.mxu0 }
  0xd4   :  { %v177_v60 = vpop.f32.mrf.mxu1 }
  0xd5   :  { %v178_v61 = vadd.f32 %v177_v60, %v163_v59 }
  0xd7   :  { %v181_v62 = vsub.f32 0.0, %v178_v61 }
  0xd9   :  { %v308_v63 = vpop.eup %307  ;;  %v184_v0 = vmul.f32 1.442695, %v181_v62 }
  0xda   :  { %v186_v1 = vadd.f32 1.0, %v308_v63 }
  0xdb   :  { %309 = vpow2.f32 %v184_v0 }
  0xdc   :  { %311 = vrcp.f32 %v186_v1 }
  0xe1   :  { %v310_v2 = vpop.eup %309 }
  0xe2   :  { %v312_v3 = vpop.eup %311  ;;  %v187_v4 = vadd.f32 1.0, %v310_v2 }
  0xe3   :  { %190 = vst [vmem:[#allocation7] sm:$0xff] %v312_v3 }
  0xe4   :  { %313 = vrcp.f32 %v187_v4 }
  0xea   :  { %v314_v5 = vpop.eup %313 }
  0xeb   :  { %191 = vst [vmem:[#allocation7 + $0x8] sm:$0xff] %v314_v5 }
  0xec   :  { %204 = dma.vmem_to_hbm [thread:$0]  %s197_s1, 256, %s199_s23, [#allocation4], %s394_s17, %s394_s17, %s395_s18  }
  0xed   :  { %391 = dma.done.wait [#allocation4], 256  }
  0xee   :  { %392 = vsyncadd [#allocation4], 4294967040 }
  0xef   :  { %209 = vsyncpa [#allocation3], 1 }
  0xf0   :  { %210 = vsyncpa [#allocation6], 1 }
  0xf1   :  { %211 = vsyncpa [#allocation4], 1 }

</bundles_post_ra>
